<compile_context>
chip_gen: v6e
topology: v6e:2x2x1
jax: 0.10.0
libtpu: 0.0.40
codegen_flags: <defaults>
</compile_context>

<pallas_src>
import functools

import jax
import jax.numpy as jnp
from jax import lax
from jax.experimental import pallas as pl
from jax.experimental.pallas import tpu as pltpu

BN_EPS = 1e-5


def _round_up(x, m):
    return (x + m - 1) // m * m


def _pick_batch_tile(n, c, hw_pad, itemsize, target_bytes=512 * 1024, max_nb=8):
    """Images per grid step: amortize tiny per-step DMAs, keep >= 2 grid steps."""
    per_img = c * hw_pad * itemsize
    nb = int(max(1, min(max_nb, target_bytes // max(per_img, 1))))
    while nb > 1 and -(-n // nb) < 2:   # keep >= 2 steps for megacore sharding
        nb //= 2
    return nb


# ------------------------------ fused kernel ------------------------------

def _shuffle_block_kernel(x1_ref, x2_ref, w1_ref, b1_ref, wm_ref, b2_ref,
                          w2_ref, b3_ref, o_ref, copy_sem, *, nb, w, hw_pad):
    """Fused ShuffleV2Block (stride==1) for `nb` images per grid step.

    x1_ref : (nb, bf, HWp)   passthrough half
    x2_ref : (nb, bf, HWp)   branch2 input half
    w1/w2  : (bf, bf)        1x1 conv weights, BN scale folded
    wm_ref : (9, bf, HWp)    depthwise taps: weight * BN scale * edge mask
    b1/b2/b3 : (bf, 1) f32   folded BN shifts
    o_ref  : (nb, bf, 2*HWp) [.., :HWp] = x1, [.., HWp:] = branch2
    """
    # x1 passthrough is pure data movement: local DMA into the (lane-aligned)
    # first half of the output block, overlapped with branch2 compute.
    cp = pltpu.make_async_copy(x1_ref, o_ref.at[:, :, :hw_pad], copy_sem)
    cp.start()

    w1 = w1_ref[...]
    w2 = w2_ref[...]
    b1 = b1_ref[...]
    b2 = b2_ref[...]
    b3 = b3_ref[...]

    taps = [(dy, dx) for dy in (-1, 0, 1) for dx in (-1, 0, 1)]

    for b in range(nb):                                    # static, unrolled
        # ---- branch2: 1x1 conv (BN scale folded) + ReLU ----
        y = jnp.dot(w1, x2_ref[b], preferred_element_type=jnp.float32)
        y = jnp.maximum(y + b1, 0.0)                       # (bf, HWp) f32

        # ---- depthwise 3x3 (pad=1): 9 lane rolls (XLU) x pre-masked,
        #      BN-folded tap weights -> 1 mul + 1 add per tap on the VPU ----
        acc = wm_ref[4] * y                                # centre tap, no roll
        for t, (dy, dx) in enumerate(taps):
            if dy == 0 and dx == 0:
                continue
            shift = (-(dy * w + dx)) % hw_pad              # out[p] = y[p+dy*W+dx]
            acc = acc + wm_ref[t] * pltpu.roll(y, shift, axis=1)
        dw = acc + b2                                      # (bf, HWp) f32

        # ---- branch2: 1x1 conv (BN scale folded) + ReLU ----
        z = jnp.dot(w2, dw.astype(w2.dtype), preferred_element_type=jnp.float32)
        z = jnp.maximum(z + b3, 0.0)

        # Second half starts at lane offset HWp (multiple of 128) -> unmasked vst.
        o_ref[b, :, hw_pad:] = z.astype(o_ref.dtype)

    cp.wait()


# ------------------------------ host wrapper ------------------------------

def _fold_bn(gamma, beta, mean, var, eps=BN_EPS):
    scale = gamma / jnp.sqrt(var + eps)
    shift = beta - mean * scale
    return scale, shift


def shuffle_v2_block_forward(x, params, stride=1, act_dtype=jnp.bfloat16):
    """Pallas implementation of ShuffleV2Block.forward (stride == 1)."""
    assert stride == 1, "only the stride==1 forward path is implemented"
    n, c, h, w = x.shape
    assert c % 2 == 0
    bf = c // 2
    hw = h * w
    hw_pad = _round_up(hw, 128)          # lane-align both output halves

    # Fold eval-mode BN into the conv weights / shifts (tiny, host side).
    s1, b1 = _fold_bn(*params["bn1"])
    s2, b2 = _fold_bn(*params["bn2"])
    s3, b3 = _fold_bn(*params["bn3"])
    w1s = (params["w1"] * s1[:, None]).astype(act_dtype)
    w2s = (params["w2"] * s3[:, None]).astype(act_dtype)
    wdw = (params["wdw"] * s2[:, None, None]).reshape(bf, 9).astype(jnp.float32)

    # Precompute the 9 edge-validity masks once and fold them into the tap
    # weights -> (9, bf, HWp), VMEM-resident via a constant index_map.
    pix = jnp.arange(hw_pad, dtype=jnp.int32)
    row, col = pix // w, pix % w
    valid_pix = pix < hw
    masks = []
    for dy in (-1, 0, 1):
        for dx in (-1, 0, 1):
            ok = (valid_pix & (row + dy >= 0) & (row + dy < h)
                  & (col + dx >= 0) & (col + dx < w))
            masks.append(ok)
    mask = jnp.stack(masks).astype(jnp.float32)            # (9, HWp)
    wm = wdw.T[:, :, None] * mask[:, None, :]              # (9, bf, HWp) f32

    b1c = b1[:, None].astype(jnp.float32)
    b2c = b2[:, None].astype(jnp.float32)
    b3c = b3[:, None].astype(jnp.float32)

    # NCHW -> (N, C, H*W): metadata-only; then zero-pad lanes / batch.
    x_r = x.astype(act_dtype).reshape(n, c, hw)
    if hw_pad != hw:
        x_r = jnp.pad(x_r, ((0, 0), (0, 0), (0, hw_pad - hw)))
    itemsize = jnp.dtype(act_dtype).itemsize
    nb = _pick_batch_tile(n, c, hw_pad, itemsize)
    n_pad = _round_up(n, nb)
    if n_pad != n:
        x_r = jnp.pad(x_r, ((0, n_pad - n), (0, 0), (0, 0)))

    kernel = functools.partial(_shuffle_block_kernel, nb=nb, w=w, hw_pad=hw_pad)
    const2 = lambda i: (0, 0)
    const3 = lambda i: (0, 0, 0)

    # Explicit VMEM budget (double-buffered act blocks + resident weights).
    act_blk = nb * bf * hw_pad * itemsize
    out_blk = nb * bf * 2 * hw_pad * itemsize
    wm_bytes = 9 * bf * hw_pad * 4
    est = 2 * (2 * act_blk + out_blk) + 2 * wm_bytes + 4 * bf * bf * itemsize
    vmem_limit = int(min(64 * 1024 * 1024, max(16 * 1024 * 1024, 4 * est)))

    out = pl.pallas_call(
        kernel,
        out_shape=jax.ShapeDtypeStruct((n_pad, bf, 2 * hw_pad), act_dtype),
        grid=(n_pad // nb,),
        in_specs=[
            pl.BlockSpec((nb, bf, hw_pad), lambda i: (i, 0, 0)),  # x1 half
            pl.BlockSpec((nb, bf, hw_pad), lambda i: (i, 1, 0)),  # x2 half
            pl.BlockSpec((bf, bf), const2),                       # w1 (BN folded)
            pl.BlockSpec((bf, 1), const2),                        # shift1
            pl.BlockSpec((9, bf, hw_pad), const3),                # masked dw taps
            pl.BlockSpec((bf, 1), const2),                        # shift2
            pl.BlockSpec((bf, bf), const2),                       # w2 (BN folded)
            pl.BlockSpec((bf, 1), const2),                        # shift3
        ],
        out_specs=pl.BlockSpec((nb, bf, 2 * hw_pad), lambda i: (i, 0, 0)),
        scratch_shapes=[pltpu.SemaphoreType.DMA],
        compiler_params=pltpu.CompilerParams(
            dimension_semantics=("parallel",),
            vmem_limit_bytes=vmem_limit),
    )(x_r, x_r, w1s, b1c, wm, b2c, w2s, b3c)

    # (n_pad, bf, 2*HWp) -> (n_pad, 2*bf, HWp) is metadata-only and IS
    # channel_shuffle(cat(x1, branch2), 2); crop padding and restore NCHW.
    out = out.reshape(n_pad, 2 * bf, hw_pad)
    return out[:n, :, :hw].reshape(n, c, h, w)


# ----------------------------- reference (plain JAX) -----------------------

def reference_forward(x, params):
    bf = x.shape[1] // 2
    x1, x2 = x[:, :bf], x[:, bf:]

    def bn(v, prm):
        g, b, m, var = prm
        s = g / jnp.sqrt(var + BN_EPS)
        return v * s[None, :, None, None] + (b - m * s)[None, :, None, None]

    y = jax.nn.relu(bn(jnp.einsum("oi,nihw->nohw", params["w1"], x2),
                       params["bn1"]))
    dw = lax.conv_general_dilated(
        y, params["wdw"][:, None, :, :], window_strides=(1, 1),
        padding=((1, 1), (1, 1)), dimension_numbers=("NCHW", "OIHW", "NCHW"),
        feature_group_count=bf)
    dw = bn(dw, params["bn2"])
    z = jax.nn.relu(bn(jnp.einsum("oi,nihw->nohw", params["w2"], dw),
                       params["bn3"]))
    out = jnp.concatenate([x1, z], axis=1)
    n, c, h, w = out.shape
    out = out.reshape(n, 2, c // 2, h, w).transpose(0, 2, 1, 3, 4)
    return out.reshape(n, c, h, w)


# ----------------------------- params -----------------------------

def init_params(key, inp, oup):
    assert inp == oup and oup % 2 == 0
    bf = oup // 2
    ks = jax.random.split(key, 6)

    def bn_params(k):
        k0, k1, k2, k3 = jax.random.split(k, 4)
        gamma = jax.random.uniform(k0, (bf,), minval=0.5, maxval=1.5)
        beta = 0.1 * jax.random.normal(k1, (bf,))
        mean = 0.1 * jax.random.normal(k2, (bf,))
        var = jax.random.uniform(k3, (bf,), minval=0.5, maxval=1.5)
        return (gamma.astype(jnp.float32), beta.astype(jnp.float32),
                mean.astype(jnp.float32), var.astype(jnp.float32))

    return {
        "w1":  (0.3 * jax.random.normal(ks[0], (bf, bf))).astype(jnp.float32),
        "bn1": bn_params(ks[1]),
        "wdw": (0.2 * jax.random.normal(ks[2], (bf, 3, 3))).astype(jnp.float32),
        "bn2": bn_params(ks[3]),
        "w2":  (0.3 * jax.random.normal(ks[4], (bf, bf))).astype(jnp.float32),
        "bn3": bn_params(ks[5]),
    }


# ----------------------------- main -----------------------------

if __name__ == "__main__":
    root = jax.random.PRNGKey(0)
    k_a, k_b = jax.random.split(root)

    def check_case(key, n, c, h, w):
        kx, kp = jax.random.split(key)
        x = jax.random.normal(kx, (n, c, h, w), dtype=jnp.float32)
        params = init_params(kp, c, c)
        ref = jax.block_until_ready(reference_forward(x, params))

        # Structural validation in f32 (tap shifts / edge masks / padding /
        # shuffle layout).  Tolerance covers MXU default-precision f32 matmul
        # differences vs the XLA reference; structural bugs produce O(1) errors.
        fwd32 = jax.jit(functools.partial(shuffle_v2_block_forward,
                                          act_dtype=jnp.float32))
        out32 = jax.block_until_ready(fwd32(x, params))
        assert out32.shape == ref.shape
        if not jnp.allclose(out32, ref, atol=5e-2, rtol=5e-2):
            raise AssertionError("f32 Pallas ShuffleV2Block mismatch vs reference")

        # Production bf16 path (bf16 HBM/VMEM traffic, f32 accumulation).
        fwd16 = jax.jit(functools.partial(shuffle_v2_block_forward,
                                          act_dtype=jnp.bfloat16))
        out16 = jax.block_until_ready(fwd16(x.astype(jnp.bfloat16), params))
        assert out16.shape == ref.shape
        if not jnp.allclose(out16.astype(jnp.float32), ref,
                            atol=1.5e-1, rtol=1.5e-1):
            raise AssertionError("bf16 Pallas ShuffleV2Block mismatch vs reference")
        return out16

    # Case A: H*W is already a multiple of 128 (no lane padding), 2 grid steps.
    o_a = check_case(k_a, n=2, c=32, h=16, w=16)
    # Case B: H*W=64 -> lane-padded to 128, batch 5 padded to the per-step
    # batch tile, several images per grid step.
    o_b = check_case(k_b, n=5, c=32, h=8, w=8)

    jax.block_until_ready((o_a, o_b))
    print("KERNEL_OK")
</pallas_src>

<mosaic_0001>
module attributes {stable_mosaic.version = 11 : i64} {
  func.func @_shuffle_block_kernel(%arg0: i32, %arg1: memref<1x16x256xf32, #tpu.memory_space<vmem>>, %arg2: memref<1x16x256xf32, #tpu.memory_space<vmem>>, %arg3: memref<16x16xf32, #tpu.memory_space<vmem>>, %arg4: memref<16x1xf32, #tpu.memory_space<vmem>>, %arg5: memref<9x16x256xf32, #tpu.memory_space<vmem>>, %arg6: memref<16x1xf32, #tpu.memory_space<vmem>>, %arg7: memref<16x16xf32, #tpu.memory_space<vmem>>, %arg8: memref<16x1xf32, #tpu.memory_space<vmem>>, %arg9: memref<1x16x512xf32, #tpu.memory_space<vmem>>, %arg10: memref<!tpu.dma_semaphore, #tpu.memory_space<semaphore_mem>>) attributes {dimension_semantics = [#tpu.dimension_semantics<parallel>], iteration_bounds = array<i64: 2>, scalar_prefetch = 0 : i64, scratch_operands = 1 : i64, tpu.core_type = #tpu.core_type<tc>, window_params = [{transform_indices = @transform_0, window_bounds = array<i64: 1, 16, 256>}, {transform_indices = @transform_1, window_bounds = array<i64: 1, 16, 256>}, {pipeline_mode = #tpu.pipeline_mode<synchronous>, transform_indices = @transform_2, window_bounds = array<i64: 16, 16>}, {pipeline_mode = #tpu.pipeline_mode<synchronous>, transform_indices = @transform_3, window_bounds = array<i64: 16, 1>}, {pipeline_mode = #tpu.pipeline_mode<synchronous>, transform_indices = @transform_4, window_bounds = array<i64: 9, 16, 256>}, {pipeline_mode = #tpu.pipeline_mode<synchronous>, transform_indices = @transform_5, window_bounds = array<i64: 16, 1>}, {pipeline_mode = #tpu.pipeline_mode<synchronous>, transform_indices = @transform_6, window_bounds = array<i64: 16, 16>}, {pipeline_mode = #tpu.pipeline_mode<synchronous>, transform_indices = @transform_7, window_bounds = array<i64: 16, 1>}, {transform_indices = @transform_8, window_bounds = array<i64: 1, 16, 512>}]} {
    %c0_i32 = arith.constant 0 : i32
    %c0_i32_0 = arith.constant 0 : i32
    %c0_i32_1 = arith.constant 0 : i32
    %0 = tpu.memref_slice %arg9[%c0_i32, %c0_i32_0, %c0_i32_1] : memref<1x16x512xf32, #tpu.memory_space<vmem>> -> memref<1x16x256xf32, #tpu.memory_space<vmem>>
    tpu.enqueue_dma source(%arg1 : memref<1x16x256xf32, #tpu.memory_space<vmem>>) target(%0 : memref<1x16x256xf32, #tpu.memory_space<vmem>>) target_semaphore(%arg10 : memref<!tpu.dma_semaphore, #tpu.memory_space<semaphore_mem>>)
    %c0 = arith.constant 0 : index
    %c0_2 = arith.constant 0 : index
    %1 = vector.load %arg3[%c0, %c0_2] : memref<16x16xf32, #tpu.memory_space<vmem>>, vector<16x16xf32>
    %c0_3 = arith.constant 0 : index
    %c0_4 = arith.constant 0 : index
    %2 = vector.load %arg7[%c0_3, %c0_4] : memref<16x16xf32, #tpu.memory_space<vmem>>, vector<16x16xf32>
    %c0_5 = arith.constant 0 : index
    %c0_6 = arith.constant 0 : index
    %3 = vector.load %arg4[%c0_5, %c0_6] : memref<16x1xf32, #tpu.memory_space<vmem>>, vector<16x1xf32>
    %c0_7 = arith.constant 0 : index
    %c0_8 = arith.constant 0 : index
    %4 = vector.load %arg6[%c0_7, %c0_8] : memref<16x1xf32, #tpu.memory_space<vmem>>, vector<16x1xf32>
    %c0_9 = arith.constant 0 : index
    %c0_10 = arith.constant 0 : index
    %5 = vector.load %arg8[%c0_9, %c0_10] : memref<16x1xf32, #tpu.memory_space<vmem>>, vector<16x1xf32>
    %c0_11 = arith.constant 0 : index
    %c0_12 = arith.constant 0 : index
    %c0_13 = arith.constant 0 : index
    %6 = vector.load %arg2[%c0_11, %c0_12, %c0_13] : memref<1x16x256xf32, #tpu.memory_space<vmem>>, vector<1x16x256xf32>
    %7 = vector.shape_cast %6 : vector<1x16x256xf32> to vector<16x256xf32>
    %cst = arith.constant dense<0.000000e+00> : vector<16x256xf32>
    %8 = tpu.matmul %1, %7, %cst {dimension_numbers = #tpu.dot_dimension_numbers<[1], [0], [0], [1], [0, 0, 1, 1], [], []>} : vector<16x16xf32>, vector<16x256xf32>, vector<16x256xf32> -> vector<16x256xf32>
    %9 = vector.broadcast %3 : vector<16x1xf32> to vector<16x256xf32>
    %10 = arith.addf %8, %9 : vector<16x256xf32>
    %cst_14 = arith.constant 0.000000e+00 : f32
    %11 = vector.broadcast %cst_14 : f32 to vector<16x256xf32>
    %12 = arith.maximumf %10, %11 : vector<16x256xf32>
    %c4 = arith.constant 4 : index
    %c0_15 = arith.constant 0 : index
    %c0_16 = arith.constant 0 : index
    %13 = vector.load %arg5[%c4, %c0_15, %c0_16] : memref<9x16x256xf32, #tpu.memory_space<vmem>>, vector<1x16x256xf32>
    %14 = vector.shape_cast %13 : vector<1x16x256xf32> to vector<16x256xf32>
    %15 = arith.mulf %14, %12 : vector<16x256xf32>
    %c0_17 = arith.constant 0 : index
    %c0_18 = arith.constant 0 : index
    %c0_19 = arith.constant 0 : index
    %16 = vector.load %arg5[%c0_17, %c0_18, %c0_19] : memref<9x16x256xf32, #tpu.memory_space<vmem>>, vector<1x16x256xf32>
    %17 = vector.shape_cast %16 : vector<1x16x256xf32> to vector<16x256xf32>
    %c17_i32 = arith.constant 17 : i32
    %18 = tpu.dynamic_rotate %12 by %c17_i32 dim 1 : vector<16x256xf32>, i32 -> vector<16x256xf32>
    %19 = arith.mulf %17, %18 : vector<16x256xf32>
    %20 = arith.addf %15, %19 : vector<16x256xf32>
    %c1 = arith.constant 1 : index
    %c0_20 = arith.constant 0 : index
    %c0_21 = arith.constant 0 : index
    %21 = vector.load %arg5[%c1, %c0_20, %c0_21] : memref<9x16x256xf32, #tpu.memory_space<vmem>>, vector<1x16x256xf32>
    %22 = vector.shape_cast %21 : vector<1x16x256xf32> to vector<16x256xf32>
    %c16_i32 = arith.constant 16 : i32
    %23 = tpu.dynamic_rotate %12 by %c16_i32 dim 1 : vector<16x256xf32>, i32 -> vector<16x256xf32>
    %24 = arith.mulf %22, %23 : vector<16x256xf32>
    %25 = arith.addf %20, %24 : vector<16x256xf32>
    %c2 = arith.constant 2 : index
    %c0_22 = arith.constant 0 : index
    %c0_23 = arith.constant 0 : index
    %26 = vector.load %arg5[%c2, %c0_22, %c0_23] : memref<9x16x256xf32, #tpu.memory_space<vmem>>, vector<1x16x256xf32>
    %27 = vector.shape_cast %26 : vector<1x16x256xf32> to vector<16x256xf32>
    %c15_i32 = arith.constant 15 : i32
    %28 = tpu.dynamic_rotate %12 by %c15_i32 dim 1 : vector<16x256xf32>, i32 -> vector<16x256xf32>
    %29 = arith.mulf %27, %28 : vector<16x256xf32>
    %30 = arith.addf %25, %29 : vector<16x256xf32>
    %c3 = arith.constant 3 : index
    %c0_24 = arith.constant 0 : index
    %c0_25 = arith.constant 0 : index
    %31 = vector.load %arg5[%c3, %c0_24, %c0_25] : memref<9x16x256xf32, #tpu.memory_space<vmem>>, vector<1x16x256xf32>
    %32 = vector.shape_cast %31 : vector<1x16x256xf32> to vector<16x256xf32>
    %c1_i32 = arith.constant 1 : i32
    %33 = tpu.dynamic_rotate %12 by %c1_i32 dim 1 : vector<16x256xf32>, i32 -> vector<16x256xf32>
    %34 = arith.mulf %32, %33 : vector<16x256xf32>
    %35 = arith.addf %30, %34 : vector<16x256xf32>
    %c5 = arith.constant 5 : index
    %c0_26 = arith.constant 0 : index
    %c0_27 = arith.constant 0 : index
    %36 = vector.load %arg5[%c5, %c0_26, %c0_27] : memref<9x16x256xf32, #tpu.memory_space<vmem>>, vector<1x16x256xf32>
    %37 = vector.shape_cast %36 : vector<1x16x256xf32> to vector<16x256xf32>
    %c255_i32 = arith.constant 255 : i32
    %38 = tpu.dynamic_rotate %12 by %c255_i32 dim 1 : vector<16x256xf32>, i32 -> vector<16x256xf32>
    %39 = arith.mulf %37, %38 : vector<16x256xf32>
    %40 = arith.addf %35, %39 : vector<16x256xf32>
    %c6 = arith.constant 6 : index
    %c0_28 = arith.constant 0 : index
    %c0_29 = arith.constant 0 : index
    %41 = vector.load %arg5[%c6, %c0_28, %c0_29] : memref<9x16x256xf32, #tpu.memory_space<vmem>>, vector<1x16x256xf32>
    %42 = vector.shape_cast %41 : vector<1x16x256xf32> to vector<16x256xf32>
    %c241_i32 = arith.constant 241 : i32
    %43 = tpu.dynamic_rotate %12 by %c241_i32 dim 1 : vector<16x256xf32>, i32 -> vector<16x256xf32>
    %44 = arith.mulf %42, %43 : vector<16x256xf32>
    %45 = arith.addf %40, %44 : vector<16x256xf32>
    %c7 = arith.constant 7 : index
    %c0_30 = arith.constant 0 : index
    %c0_31 = arith.constant 0 : index
    %46 = vector.load %arg5[%c7, %c0_30, %c0_31] : memref<9x16x256xf32, #tpu.memory_space<vmem>>, vector<1x16x256xf32>
    %47 = vector.shape_cast %46 : vector<1x16x256xf32> to vector<16x256xf32>
    %c240_i32 = arith.constant 240 : i32
    %48 = tpu.dynamic_rotate %12 by %c240_i32 dim 1 : vector<16x256xf32>, i32 -> vector<16x256xf32>
    %49 = arith.mulf %47, %48 : vector<16x256xf32>
    %50 = arith.addf %45, %49 : vector<16x256xf32>
    %c8 = arith.constant 8 : index
    %c0_32 = arith.constant 0 : index
    %c0_33 = arith.constant 0 : index
    %51 = vector.load %arg5[%c8, %c0_32, %c0_33] : memref<9x16x256xf32, #tpu.memory_space<vmem>>, vector<1x16x256xf32>
    %52 = vector.shape_cast %51 : vector<1x16x256xf32> to vector<16x256xf32>
    %c239_i32 = arith.constant 239 : i32
    %53 = tpu.dynamic_rotate %12 by %c239_i32 dim 1 : vector<16x256xf32>, i32 -> vector<16x256xf32>
    %54 = arith.mulf %52, %53 : vector<16x256xf32>
    %55 = arith.addf %50, %54 : vector<16x256xf32>
    %56 = vector.broadcast %4 : vector<16x1xf32> to vector<16x256xf32>
    %57 = arith.addf %55, %56 : vector<16x256xf32>
    %cst_34 = arith.constant dense<0.000000e+00> : vector<16x256xf32>
    %58 = tpu.matmul %2, %57, %cst_34 {dimension_numbers = #tpu.dot_dimension_numbers<[1], [0], [0], [1], [0, 0, 1, 1], [], []>} : vector<16x16xf32>, vector<16x256xf32>, vector<16x256xf32> -> vector<16x256xf32>
    %59 = vector.broadcast %5 : vector<16x1xf32> to vector<16x256xf32>
    %60 = arith.addf %58, %59 : vector<16x256xf32>
    %cst_35 = arith.constant 0.000000e+00 : f32
    %61 = vector.broadcast %cst_35 : f32 to vector<16x256xf32>
    %62 = arith.maximumf %60, %61 : vector<16x256xf32>
    %c0_36 = arith.constant 0 : index
    %c0_37 = arith.constant 0 : index
    %c256 = arith.constant 256 : index
    %63 = vector.load %arg9[%c0_36, %c0_37, %c256] : memref<1x16x512xf32, #tpu.memory_space<vmem>>, vector<1x16x256xf32>
    %64 = vector.shape_cast %63 : vector<1x16x256xf32> to vector<16x256xf32>
    %65 = vector.shape_cast %62 : vector<16x256xf32> to vector<1x16x256xf32>
    tpu.vector_store %arg9[%c0_36, %c0_37, %c256], %65 {strides = array<i32>} : memref<1x16x512xf32, #tpu.memory_space<vmem>>, vector<1x16x256xf32>,
    %c0_i32_38 = arith.constant 0 : i32
    %c0_i32_39 = arith.constant 0 : i32
    %c0_i32_40 = arith.constant 0 : i32
    %66 = tpu.memref_slice %arg9[%c0_i32_38, %c0_i32_39, %c0_i32_40] : memref<1x16x512xf32, #tpu.memory_space<vmem>> -> memref<1x16x256xf32, #tpu.memory_space<vmem>>
    tpu.wait_dma2 semaphore(%arg10 : memref<!tpu.dma_semaphore, #tpu.memory_space<semaphore_mem>>) src(%arg1 : memref<1x16x256xf32, #tpu.memory_space<vmem>>) dst(%66 : memref<1x16x256xf32, #tpu.memory_space<vmem>>)
    return
  }
  func.func @transform_0(%arg0: i32) -> (i32, i32, i32) {
    %c0_i32 = arith.constant 0 : i32
    %c0_i32_0 = arith.constant 0 : i32
    %c0_i32_1 = arith.constant 0 : i32
    return %arg0, %c0_i32, %c0_i32_0 : i32, i32, i32
  }
  func.func @transform_1(%arg0: i32) -> (i32, i32, i32) {
    %c1_i32 = arith.constant 1 : i32
    %c0_i32 = arith.constant 0 : i32
    %c0_i32_0 = arith.constant 0 : i32
    return %arg0, %c1_i32, %c0_i32 : i32, i32, i32
  }
  func.func @transform_2(%arg0: i32) -> (i32, i32) {
    %c0_i32 = arith.constant 0 : i32
    %c0_i32_0 = arith.constant 0 : i32
    %c0_i32_1 = arith.constant 0 : i32
    return %c0_i32, %c0_i32_0 : i32, i32
  }
  func.func @transform_3(%arg0: i32) -> (i32, i32) {
    %c0_i32 = arith.constant 0 : i32
    %c0_i32_0 = arith.constant 0 : i32
    %c0_i32_1 = arith.constant 0 : i32
    return %c0_i32, %c0_i32_0 : i32, i32
  }
  func.func @transform_4(%arg0: i32) -> (i32, i32, i32) {
    %c0_i32 = arith.constant 0 : i32
    %c0_i32_0 = arith.constant 0 : i32
    %c0_i32_1 = arith.constant 0 : i32
    %c0_i32_2 = arith.constant 0 : i32
    return %c0_i32, %c0_i32_0, %c0_i32_1 : i32, i32, i32
  }
  func.func @transform_5(%arg0: i32) -> (i32, i32) {
    %c0_i32 = arith.constant 0 : i32
    %c0_i32_0 = arith.constant 0 : i32
    %c0_i32_1 = arith.constant 0 : i32
    return %c0_i32, %c0_i32_0 : i32, i32
  }
  func.func @transform_6(%arg0: i32) -> (i32, i32) {
    %c0_i32 = arith.constant 0 : i32
    %c0_i32_0 = arith.constant 0 : i32
    %c0_i32_1 = arith.constant 0 : i32
    return %c0_i32, %c0_i32_0 : i32, i32
  }
  func.func @transform_7(%arg0: i32) -> (i32, i32) {
    %c0_i32 = arith.constant 0 : i32
    %c0_i32_0 = arith.constant 0 : i32
    %c0_i32_1 = arith.constant 0 : i32
    return %c0_i32, %c0_i32_0 : i32, i32
  }
  func.func @transform_8(%arg0: i32) -> (i32, i32, i32) {
    %c0_i32 = arith.constant 0 : i32
    %c0_i32_0 = arith.constant 0 : i32
    %c0_i32_1 = arith.constant 0 : i32
    return %arg0, %c0_i32, %c0_i32_0 : i32, i32, i32
  }
}

</mosaic_0001>

<bundles_post_ra>
// kernel: shuffle_v2_block_forward.1
= control target key start
LH: loop header
LB: loop body
LE: loop exit
PB: predicated region body
PF: predicated region fallthrough
CT: control target
= control target key end

     0   :  { %s1059_s27 = smov 0   ;;  %s1409_s0 = inlined_call_operand.vmem [shape: f32[2,32,256], index: 0, kind: input, shape index: {}, may-alias: {0,1}]   ;;  %s1410_s1 = inlined_call_operand.vmem [shape: f32[2,32,256], index: 1, kind: input, shape index: {}, may-alias: {0,1}]   ;;  %s1411_s2 = inlined_call_operand.vmem [shape: f32[16,16], index: 2, kind: input, shape index: {}]   ;;  %s1412_s3 = inlined_call_operand.vmem [shape: f32[16,1], index: 3, kind: input, shape index: {}]   ;;  %s1413_s4 = inlined_call_operand.vmem [shape: f32[9,16,256], index: 4, kind: input, shape index: {}]   ;;  %s1414_s5 = inlined_call_operand.vmem [shape: f32[16,1], index: 5, kind: input, shape index: {}]   ;;  %s1415_s6 = inlined_call_operand.vmem [shape: f32[16,16], index: 6, kind: input, shape index: {}]   ;;  %s1416_s7 = inlined_call_operand.vmem [shape: f32[16,1], index: 7, kind: input, shape index: {}]   ;;  %s1417_s8 = inlined_call_operand.vmem [shape: f32[2,16,512], index: 8, kind: output, shape index: {}]  }
   0x1 LB: > { %s917_s28 = sadd.s32 4294967295, %s1002_s27   ;;  %p921_p0 = scmp.ge.s32.totalorder %s1002_s27, 1  ;;  %s1002_s27 = sphi %s1059_s27, %s18_s27  }
   0x2   : > { %p273_p1 = scmp.lt.s32.totalorder %s1002_s27, 3 }
   0x4   : > { %p274_p2 = pnand %p921_p0, %p273_p1 }
   0x5   : > { %p313_p3 = scmp.lt.s32.totalorder (!%p274_p2), %s917_s28, 1 }
   0x6   : > { %277 = sbr.rel (%p274_p2) target bundleno = 621 (0x26d), region = 52 }
   0xb   : > { %s1419_s28 = smov (!%p313_p3, %s917_s28), 1 }
   0xc   : > { %s971_s29 = sshll.u32 %s1419_s28, 6 }
   0xd   : > { %s317_s10 = scalar_lea.vmem %s1409_s0, %s971_s29  ;;  %s875_s13 = scalar_lea.vmem %s1410_s1, %s971_s29 }
   0xe   : > { %s1076_s16 = scalar_lea.vmem %s1417_s8, %s971_s29  ;;  %v364_v0 = vld [vmem:[%s317_s10] sm:$0xff]  ;;  %v366_v1 = vld [vmem:[%s317_s10 + $0x8] sm:$0xff]  ;;  %v368_v2 = vld [vmem:[%s317_s10 + $0x10] sm:$0xff] }
   0xf   : > { %365 = vst [vmem:[%s1076_s16] sm:$0xff] %v364_v0  ;;  %367 = vst [vmem:[%s1076_s16 + $0x8] sm:$0xff] %v366_v1  ;;  %v370_v3 = vld [vmem:[%s317_s10 + $0x18] sm:$0xff] }
  0x10   : > { %369 = vst [vmem:[%s1076_s16 + $0x20] sm:$0xff] %v368_v2  ;;  %371 = vst [vmem:[%s1076_s16 + $0x28] sm:$0xff] %v370_v3 }
  0x11   : > { %379 = vsyncadd [#allocation2], 512  ;;  %v931_v4 = vld [vmem:[%s875_s13 + $0x38] sm:$0xff]  ;;  %v930_v5 = vld [vmem:[%s875_s13 + $0x30] sm:$0xff]  ;;  %v1004_v8 = vmov 0.0   ;;  %vm404_vm0 = vcmask 130048   ;;  %v513_v45 = vlaneseq }
  0x12   : > { %439 = vmatprep.subr.mxu0 %v931_v4  ;;  %v929_v6 = vld [vmem:[%s875_s13 + $0x28] sm:$0xff]  ;;  %v928_v7 = vld [vmem:[%s875_s13 + $0x20] sm:$0xff]  ;;  %475 = vmatprep.mubr.f32.mxu0 %v1004_v8  ;;  %v1005_v10 = vmov 0   ;;  %s1006_s28 = smov 111   ;;  %s1007_s29 = smov 17  }
  0x13   : > { %440 = vmatpush1.msra.mxu0 %v930_v5  ;;  %v380_v9 = vld [vmem:[%s1411_s2] sm:$0xff]  ;;  %992 = vset.pattern.permute.xlu0 %v1005_v10  ;;  %v385_v11 = vld [vmem:[%s1412_s3 + $0x8] sm:$0xff]  ;;  %s1008_s30 = smov 16   ;;  %s1009_s9 = smov 15   ;;  %v1169_v48 = vand.u32 127, %v513_v45  ;;  %v936_v45 = vld [vmem:[%s1413_s4 + $0x90] sm:$0xff] }
  0x14   : > { %441 = vmatprep.subr.mxu0 %v929_v6  ;;  %401 = vperm.xlu0 %992, %v385_v11   ;;  %v384_v12 = vld [vmem:[%s1412_s3] sm:$0xff]  ;;  %v381_v13 = vld [vmem:[%s1411_s2 + $0x8] sm:$0xff]  ;;  %s1010_s10 = smov 1   ;;  %s1011_s11 = smov 127  }
  0x15   : > { %442 = vmatpush1.msra.mxu0 %v928_v7  ;;  %993 = vset.pattern.permute.xlu1 %v1005_v10  ;;  %v387_v14 = vld [vmem:[%s1414_s5 + $0x8] sm:$0xff]  ;;  %s1012_s12 = smov 113   ;;  %s1013_s13 = smov 112   ;;  %v388_v29 = vld [vmem:[%s1416_s7] sm:$0xff]  ;;  %vm515_vm1 = vcmp.lt.s32.totalorder %v1169_v48, 17  ;;  %vm541_vm2 = vcmp.lt.s32.totalorder %v1169_v48, 16 }
  0x16   : > { %932 = vmatmul.mubr.msk.f32.vlgmr.msra.gmra.mxu0 %vm404_vm0, %v380_v9  ;;  %804 = vmatprep.mubr.f32.mxu1 %v1004_v8  ;;  %v386_v30 = vld [vmem:[%s1414_s5] sm:$0xff]  ;;  %v389_v31 = vld [vmem:[%s1416_s7 + $0x8] sm:$0xff]  ;;  %vm567_vm3 = vcmp.lt.s32.totalorder %v1169_v48, 15  ;;  %vm593_vm4 = vcmp.lt.s32.totalorder %v1169_v48, 1  ;;  %vm619_vm5 = vcmp.lt.s32.totalorder %v1169_v48, 127  ;;  %vm645_vm6 = vcmp.lt.s32.totalorder %v1169_v48, 113 }
  0x17   : > { %481 = vmatprep.mubr.f32.mxu0 %v1004_v8  ;;  %v501_v51 = vld [vmem:[%s1413_s4] sm:$0xff]  ;;  %v502_v52 = vld [vmem:[%s1413_s4 + $0x8] sm:$0xff]  ;;  %vm671_vm7 = vcmp.lt.s32.totalorder %v1169_v48, 112  ;;  %vm697_vm8 = vcmp.lt.s32.totalorder %v1169_v48, 111 }
  0x18   : > { %396 = vperm.xlu0 %992, %v384_v12   ;;  %v934_v57 = vld [vmem:[%s1413_s4 + $0x80] sm:$0xff]  ;;  %v935_v58 = vld [vmem:[%s1413_s4 + $0x88] sm:$0xff] }
  0x19   : > { %v938_v59 = vld [vmem:[%s1413_s4 + $0x20] sm:$0xff]  ;;  %v939_v60 = vld [vmem:[%s1413_s4 + $0x28] sm:$0xff] }
  0x1a   : > { %933 = vmatmul.mubr.msk.f32.gmra.mxu0 %vm404_vm0, %v381_v13  ;;  %v942_v7 = vld [vmem:[%s1413_s4 + $0x40] sm:$0xff]  ;;  %v943_v9 = vld [vmem:[%s1413_s4 + $0x48] sm:$0xff] }
  0x1b   : > { %v382_v48 = vld [vmem:[%s1415_s6] sm:$0xff] }
  0x1c   : > { %717 = vperm.xlu0 %992, %v387_v14   ;;  %v946_v14 = vld [vmem:[%s1413_s4 + $0x60] sm:$0xff] }
  0x8f   : > { %v402_v15 = vpop.permute.xlu0 %401 }
  0x93   : > { %v397_v16 = vpop.permute.xlu0 %396 }
  0x97   : > { %v1159_v32 = vpop.permute.xlu0 %717 }
  0xd6   : > { %v477_v17 = vpop.f32.mrf.mxu0 }
  0xd7   : > { %v478_v18 = vadd.f32 %v477_v17, %v397_v16 }
  0xd8   : > { %v479_v19 = vpop.f32.mrf.mxu0 }
  0xd9   : > { %v1102_v20 = vmax.f32 %v478_v18, 0.0  ;;  %v480_v21 = vadd.f32 %v479_v19, %v397_v16 }
  0xda   : > { %v483_v23 = vpop.f32.mrf.mxu0 }
  0xdb   : > { %689 = vrot.lane.b32.xlu1 %v1102_v20, %s1006_s28  ;;  %505 = vrot.lane.b32.xlu0 %v1102_v20, %s1007_s29  ;;  %v1108_v22 = vmax.f32 %v480_v21, 0.0  ;;  %v484_v24 = vadd.f32 %v483_v23, %v402_v15  ;;  %v497_v2 = vmul.f32 %v934_v57, %v1102_v20 }
  0xdc   : > { %v485_v26 = vpop.f32.mrf.mxu0 }
  0xdd   : > { %v1123_v25 = vmax.f32 %v484_v24, 0.0  ;;  %v486_v27 = vadd.f32 %v485_v26, %v402_v15  ;;  %v498_v1 = vmul.f32 %v935_v58, %v1108_v22  ;;  %v947_v15 = vld [vmem:[%s1413_s4 + $0x68] sm:$0xff] }
  0xde   : > { %v955_v58 = vld [vmem:[%s1413_s4 + $0xc8] sm:$0xff] }
  0xdf   : > { %509 = vrot.lane.b32.xlu1 %v1108_v22, %s1007_s29  ;;  %533 = vrot.lane.b32.xlu0 %v1102_v20, %s1008_s30  ;;  %v1130_v28 = vmax.f32 %v486_v27, 0.0  ;;  %v950_v27 = vld [vmem:[%s1413_s4 + $0xa0] sm:$0xff] }
  0xe3   : > { %537 = vrot.lane.b32.xlu1 %v1108_v22, %s1008_s30  ;;  %559 = vrot.lane.b32.xlu0 %v1102_v20, %s1009_s9 }
  0xe7   : > { %563 = vrot.lane.b32.xlu1 %v1108_v22, %s1009_s9  ;;  %585 = vrot.lane.b32.xlu0 %v1102_v20, %s1010_s10 }
  0xeb   : > { %589 = vrot.lane.b32.xlu1 %v1108_v22, %s1010_s10  ;;  %611 = vrot.lane.b32.xlu0 %v1102_v20, %s1011_s11 }
  0xef   : > { %615 = vrot.lane.b32.xlu1 %v1108_v22, %s1011_s11  ;;  %637 = vrot.lane.b32.xlu0 %v1102_v20, %s1012_s12 }
  0xf3   : > { %641 = vrot.lane.b32.xlu1 %v1108_v22, %s1012_s12  ;;  %663 = vrot.lane.b32.xlu0 %v1102_v20, %s1013_s13 }
  0xf7   : > { %667 = vrot.lane.b32.xlu1 %v1108_v22, %s1013_s13  ;;  %535 = vrot.lane.b32.xlu0 %v1123_v25, %s1008_s30 }
  0xfb   : > { %507 = vrot.lane.b32.xlu1 %v1123_v25, %s1007_s29  ;;  %561 = vrot.lane.b32.xlu0 %v1123_v25, %s1009_s9 }
  0xff   : > { %511 = vrot.lane.b32.xlu1 %v1130_v28, %s1007_s29  ;;  %587 = vrot.lane.b32.xlu0 %v1123_v25, %s1010_s10 }
 0x103   : > { %539 = vrot.lane.b32.xlu1 %v1130_v28, %s1008_s30  ;;  %613 = vrot.lane.b32.xlu0 %v1123_v25, %s1011_s11 }
 0x107   : > { %565 = vrot.lane.b32.xlu1 %v1130_v28, %s1009_s9  ;;  %639 = vrot.lane.b32.xlu0 %v1123_v25, %s1012_s12 }
 0x10b   : > { %591 = vrot.lane.b32.xlu1 %v1130_v28, %s1010_s10  ;;  %665 = vrot.lane.b32.xlu0 %v1123_v25, %s1013_s13 }
 0x10f   : > { %617 = vrot.lane.b32.xlu1 %v1130_v28, %s1011_s11  ;;  %691 = vrot.lane.b32.xlu0 %v1123_v25, %s1006_s28 }
 0x113   : > { %643 = vrot.lane.b32.xlu1 %v1130_v28, %s1012_s12  ;;  %693 = vrot.lane.b32.xlu0 %v1108_v22, %s1006_s28 }
 0x117   : > { %669 = vrot.lane.b32.xlu1 %v1130_v28, %s1013_s13  ;;  %726 = vperm.xlu0 %992, %v388_v29   ;;  %v951_v29 = vld [vmem:[%s1413_s4 + $0xa8] sm:$0xff] }
 0x11b   : > { %695 = vrot.lane.b32.xlu1 %v1130_v28, %s1006_s28 }
 0x11f   : > { %712 = vperm.xlu1 %993, %v386_v30  }
 0x123   : > { %731 = vperm.xlu1 %993, %v389_v31  }
 0x14d   : > { %v1161_v33 = vpop.permute.xlu1 %689  ;;  %v506_v34 = vpop.permute.xlu0 %505 }
 0x151   : > { %v510_v35 = vpop.permute.xlu1 %509  ;;  %v534_v36 = vpop.permute.xlu0 %533 }
 0x152   : > { %v516_v53 = vsel %vm515_vm1, %v506_v34, %v510_v35  ;;  %v518_v54 = vsel %vm515_vm1, %v510_v35, %v506_v34 }
 0x153   : > { %v520_v63 = vmul.f32 %v518_v54, %v501_v51  ;;  %v521_v0 = vmul.f32 %v516_v53, %v502_v52  ;;  %v937_v51 = vld [vmem:[%s1413_s4 + $0x98] sm:$0xff]  ;;  %v954_v54 = vld [vmem:[%s1413_s4 + $0xc0] sm:$0xff] }
 0x155   : > { %v538_v37 = vpop.permute.xlu1 %537  ;;  %v560_v38 = vpop.permute.xlu0 %559  ;;  %v524_v12 = vadd.f32 %v520_v63, %v497_v2  ;;  %v525_v13 = vadd.f32 %v521_v0, %v498_v1  ;;  %v959_v0 = vld [vmem:[%s1413_s4 + $0xe8] sm:$0xff] }
 0x156   : > { %v542_v61 = vsel %vm541_vm2, %v534_v36, %v538_v37  ;;  %v544_v62 = vsel %vm541_vm2, %v538_v37, %v534_v36  ;;  %v503_v36 = vld [vmem:[%s1413_s4 + $0x10] sm:$0xff]  ;;  %v504_v37 = vld [vmem:[%s1413_s4 + $0x18] sm:$0xff] }
 0x157   : > { %v546_v5 = vmul.f32 %v938_v59, %v544_v62  ;;  %v547_v6 = vmul.f32 %v939_v60, %v542_v61  ;;  %v940_v61 = vld [vmem:[%s1413_s4 + $0x30] sm:$0xff]  ;;  %v941_v62 = vld [vmem:[%s1413_s4 + $0x38] sm:$0xff] }
 0x159   : > { %v564_v39 = vpop.permute.xlu1 %563  ;;  %v586_v40 = vpop.permute.xlu0 %585  ;;  %v550_v22 = vadd.f32 %v546_v5, %v524_v12  ;;  %v551_v23 = vadd.f32 %v547_v6, %v525_v13 }
 0x15a   : > { %v568_v10 = vsel %vm567_vm3, %v560_v38, %v564_v39  ;;  %v570_v11 = vsel %vm567_vm3, %v564_v39, %v560_v38 }
 0x15b   : > { %v572_v18 = vmul.f32 %v942_v7, %v570_v11  ;;  %v573_v19 = vmul.f32 %v943_v9, %v568_v10  ;;  %v944_v10 = vld [vmem:[%s1413_s4 + $0x50] sm:$0xff]  ;;  %v945_v11 = vld [vmem:[%s1413_s4 + $0x58] sm:$0xff] }
 0x15d   : > { %v590_v41 = vpop.permute.xlu1 %589  ;;  %v612_v42 = vpop.permute.xlu0 %611  ;;  %v576_v34 = vadd.f32 %v572_v18, %v550_v22  ;;  %v577_v35 = vadd.f32 %v573_v19, %v551_v23  ;;  %v949_v22 = vld [vmem:[%s1413_s4 + $0x78] sm:$0xff] }
 0x15e   : > { %v594_v16 = vsel %vm593_vm4, %v586_v40, %v590_v41  ;;  %v596_v17 = vsel %vm593_vm4, %v590_v41, %v586_v40 }
 0x15f   : > { %v598_v24 = vmul.f32 %v946_v14, %v596_v17  ;;  %v599_v26 = vmul.f32 %v947_v15, %v594_v16 }
 0x161   : > { %v616_v43 = vpop.permute.xlu1 %615  ;;  %v1163_v44 = vpop.permute.xlu0 %637  ;;  %v602_v52 = vadd.f32 %v598_v24, %v576_v34  ;;  %v603_v53 = vadd.f32 %v599_v26, %v577_v35  ;;  %v952_v34 = vld [vmem:[%s1413_s4 + $0xb0] sm:$0xff] }
 0x162   : > { %v620_v30 = vsel %vm619_vm5, %v612_v42, %v616_v43  ;;  %v622_v31 = vsel %vm619_vm5, %v616_v43, %v612_v42 }
 0x163   : > { %v624_v42 = vmul.f32 %v950_v27, %v620_v30  ;;  %v625_v43 = vmul.f32 %v951_v29, %v622_v31 }
 0x165   : > { %v1165_v46 = vpop.permute.xlu1 %641  ;;  %v1167_v47 = vpop.permute.xlu0 %663  ;;  %v628_v7 = vadd.f32 %v624_v42, %v602_v52  ;;  %v629_v9 = vadd.f32 %v625_v43, %v603_v53 }
 0x166   : > { %v648_v57 = vsel %vm645_vm6, %v1165_v46, %v1163_v44 }
 0x169   : > { %v1171_v49 = vpop.permute.xlu1 %667  ;;  %v1173_v50 = vpop.permute.xlu0 %535 }
 0x16a   : > { %v672_v1 = vsel %vm671_vm7, %v1167_v47, %v1171_v49  ;;  %v674_v2 = vsel %vm671_vm7, %v1171_v49, %v1167_v47  ;;  %v651_v49 = vmul.f32 %v955_v58, %v648_v57 }
 0x16b   : > { %v677_v15 = vmul.f32 %v959_v0, %v674_v2  ;;  %v960_v0 = vld [vmem:[%s1413_s4 + $0xf0] sm:$0xff] }
 0x16c   : > { %v655_v29 = vadd.f32 %v651_v49, %v629_v9 }
 0x16d   : > { %v508_v55 = vpop.permute.xlu1 %507  ;;  %v1187_v56 = vpop.permute.xlu0 %561 }
 0x16e   : > { %v681_v43 = vadd.f32 %v677_v15, %v655_v29 }
 0x171   : > { %v512_v3 = vpop.permute.xlu1 %511  ;;  %v1209_v4 = vpop.permute.xlu0 %587 }
 0x172   : > { %v517_v38 = vsel %vm515_vm1, %v508_v55, %v512_v3  ;;  %v519_v39 = vsel %vm515_vm1, %v512_v3, %v508_v55  ;;  %v646_v55 = vsel %vm645_vm6, %v1163_v44, %v1165_v46  ;;  %v958_v46 = vld [vmem:[%s1413_s4 + $0xe0] sm:$0xff]  ;;  %v500_v3 = vmul.f32 %v937_v51, %v1130_v28 }
 0x173   : > { %v522_v59 = vmul.f32 %v519_v39, %v503_v36  ;;  %v523_v60 = vmul.f32 %v517_v38, %v504_v37  ;;  %v650_v28 = vmul.f32 %v954_v54, %v646_v55  ;;  %v676_v14 = vmul.f32 %v958_v46, %v672_v1  ;;  %v953_v37 = vld [vmem:[%s1413_s4 + $0xb8] sm:$0xff]  ;;  %v962_v39 = vld [vmem:[%s1413_s4 + $0x100] sm:$0xff]  ;;  %v956_v54 = vld [vmem:[%s1413_s4 + $0xd0] sm:$0xff] }
 0x175   : > { %v540_v20 = vpop.permute.xlu1 %539  ;;  %v1232_v21 = vpop.permute.xlu0 %613  ;;  %v527_v17 = vadd.f32 %v523_v60, %v500_v3  ;;  %v654_v27 = vadd.f32 %v650_v28, %v628_v7  ;;  %v965_v28 = vld [vmem:[%s1413_s4 + $0x118] sm:$0xff] }
 0x176   : > { %v543_v63 = vsel %vm541_vm2, %v1173_v50, %v540_v20  ;;  %v545_v44 = vsel %vm541_vm2, %v540_v20, %v1173_v50  ;;  %v499_v50 = vmul.f32 %v936_v45, %v1123_v25  ;;  %v948_v20 = vld [vmem:[%s1413_s4 + $0x70] sm:$0xff] }
 0x177   : > { %v548_v12 = vmul.f32 %v940_v61, %v545_v44  ;;  %v549_v13 = vmul.f32 %v941_v62, %v543_v63  ;;  %v680_v42 = vadd.f32 %v676_v14, %v654_v27 }
 0x178   : > { %v526_v16 = vadd.f32 %v522_v59, %v499_v50 }
 0x179   : > { %v566_v40 = vpop.permute.xlu1 %565  ;;  %v1255_v41 = vpop.permute.xlu0 %639  ;;  %v553_v31 = vadd.f32 %v549_v13, %v527_v17 }
 0x17a   : > { %v569_v47 = vsel %vm567_vm3, %v1187_v56, %v566_v40  ;;  %v571_v25 = vsel %vm567_vm3, %v566_v40, %v1187_v56  ;;  %v552_v30 = vadd.f32 %v548_v12, %v526_v16  ;;  %v963_v40 = vld [vmem:[%s1413_s4 + $0x108] sm:$0xff] }
 0x17b   : > { %v574_v18 = vmul.f32 %v944_v10, %v571_v25  ;;  %v575_v19 = vmul.f32 %v945_v11, %v569_v47  ;;  %v964_v25 = vld [vmem:[%s1413_s4 + $0x110] sm:$0xff] }
 0x17d   : > { %v592_v5 = vpop.permute.xlu1 %591  ;;  %v1306_v6 = vpop.permute.xlu0 %665  ;;  %v578_v45 = vadd.f32 %v574_v18, %v552_v30  ;;  %v579_v51 = vadd.f32 %v575_v19, %v553_v31 }
 0x17e   : > { %v595_v56 = vsel %vm593_vm4, %v1209_v4, %v592_v5  ;;  %v597_v23 = vsel %vm593_vm4, %v592_v5, %v1209_v4 }
 0x17f   : > { %v600_v35 = vmul.f32 %v948_v20, %v597_v23  ;;  %v601_v36 = vmul.f32 %v949_v22, %v595_v56 }
 0x181   : > { %v618_v24 = vpop.permute.xlu1 %617  ;;  %v692_v26 = vpop.permute.xlu0 %691  ;;  %v604_v44 = vadd.f32 %v600_v35, %v578_v45  ;;  %v605_v46 = vadd.f32 %v601_v36, %v579_v51 }
 0x182   : > { %v621_v4 = vsel %vm619_vm5, %v1232_v21, %v618_v24  ;;  %v623_v38 = vsel %vm619_vm5, %v618_v24, %v1232_v21  ;;  %v957_v21 = vld [vmem:[%s1413_s4 + $0xd8] sm:$0xff] }
 0x183   : > { %v626_v60 = vmul.f32 %v952_v34, %v621_v4  ;;  %v627_v61 = vmul.f32 %v953_v37, %v623_v38 }
 0x185   : > { %v644_v52 = vpop.permute.xlu1 %643  ;;  %v694_v53 = vpop.permute.xlu0 %693  ;;  %v630_v9 = vadd.f32 %v626_v60, %v604_v44  ;;  %v631_v10 = vadd.f32 %v627_v61, %v605_v46 }
 0x186   : > { %v647_v55 = vsel %vm645_vm6, %v1255_v41, %v644_v52  ;;  %v649_v57 = vsel %vm645_vm6, %v644_v52, %v1255_v41  ;;  %v698_v58 = vsel %vm697_vm8, %v1161_v33, %v694_v53  ;;  %v700_v59 = vsel %vm697_vm8, %v694_v53, %v1161_v33  ;;  %v961_v41 = vld [vmem:[%s1413_s4 + $0xf8] sm:$0xff] }
 0x187   : > { %v702_v62 = vmul.f32 %v962_v39, %v698_v58  ;;  %v703_v63 = vmul.f32 %v963_v40, %v700_v59  ;;  %v652_v1 = vmul.f32 %v956_v54, %v647_v55  ;;  %v653_v2 = vmul.f32 %v957_v21, %v649_v57 }
 0x189   : > { %v670_v50 = vpop.permute.xlu1 %669  ;;  %v706_v3 = vadd.f32 %v702_v62, %v680_v42  ;;  %v707_v5 = vadd.f32 %v703_v63, %v681_v43  ;;  %v656_v49 = vadd.f32 %v652_v1, %v630_v9  ;;  %v657_v12 = vadd.f32 %v653_v2, %v631_v10 }
 0x18a   : > { %v673_v33 = vsel %vm671_vm7, %v1306_v6, %v670_v50  ;;  %v675_v7 = vsel %vm671_vm7, %v670_v50, %v1306_v6 }
 0x18b   : > { %v678_v11 = vmul.f32 %v960_v0, %v673_v33  ;;  %v679_v47 = vmul.f32 %v961_v41, %v675_v7 }
 0x18d   : > { %v696_v13 = vpop.permute.xlu1 %695  ;;  %v682_v15 = vadd.f32 %v678_v11, %v656_v49  ;;  %v683_v18 = vadd.f32 %v679_v47, %v657_v12 }
 0x18e   : > { %v699_v14 = vsel %vm697_vm8, %v692_v26, %v696_v13  ;;  %v701_v6 = vsel %vm697_vm8, %v696_v13, %v692_v26 }
 0x18f   : > { %v704_v16 = vmul.f32 %v964_v25, %v699_v14  ;;  %v705_v17 = vmul.f32 %v965_v28, %v701_v6 }
 0x191   : > { %v709_v19 = vadd.f32 %v705_v17, %v683_v18  ;;  %v708_v20 = vadd.f32 %v704_v16, %v682_v15 }
 0x192   : > { %v727_v26 = vpop.permute.xlu0 %726 }
 0x193   : > { %v723_v22 = vadd.f32 %v1159_v32, %v709_v19  ;;  %v722_v56 = vadd.f32 %v1159_v32, %v708_v20  ;;  %v383_v32 = vld [vmem:[%s1415_s6 + $0x8] sm:$0xff] }
 0x195   : > { %768 = vmatprep.subr.mxu1 %v723_v22 }
 0x196   : > { %769 = vmatpush1.msra.mxu1 %v722_v56 }
 0x19a   : > { %v713_v23 = vpop.permute.xlu1 %712 }
 0x19b   : > { %v720_v24 = vadd.f32 %v713_v23, %v706_v3  ;;  %v721_v27 = vadd.f32 %v713_v23, %v707_v5 }
 0x19d   : > { %770 = vmatprep.subr.mxu1 %v721_v27 }
 0x19e   : > { %771 = vmatpush1.msra.mxu1 %v720_v24  ;;  %v732_v36 = vpop.permute.xlu1 %731 }
 0x19f   : > { %966 = vmatmul.mubr.msk.f32.vlgmr.msra.gmra.mxu1 %vm404_vm0, %v382_v48 }
 0x1a0   : > { %810 = vmatprep.mubr.f32.mxu1 %v1004_v8 }
 0x1a3   : > { %967 = vmatmul.mubr.msk.f32.gmra.mxu1 %vm404_vm0, %v383_v32 }
 0x25f   : > { %v806_v29 = vpop.f32.mrf.mxu1 }
 0x260   : > { %v807_v30 = vadd.f32 %v806_v29, %v727_v26 }
 0x261   : > { %v808_v31 = vpop.f32.mrf.mxu1 }
 0x262   : > { %v817_v34 = vmax.f32 %v807_v30, 0.0  ;;  %v809_v35 = vadd.f32 %v808_v31, %v727_v26 }
 0x263   : > { %v812_v37 = vpop.f32.mrf.mxu1 }
 0x264   : > { %821 = vst [vmem:[%s1076_s16 + $0x10] sm:$0xff] %v817_v34  ;;  %v818_v4 = vmax.f32 %v809_v35, 0.0  ;;  %v813_v38 = vadd.f32 %v812_v37, %v732_v36 }
 0x265   : > { %v814_v8 = vpop.f32.mrf.mxu1 }
 0x266   : > { %822 = vst [vmem:[%s1076_s16 + $0x18] sm:$0xff] %v818_v4  ;;  %v819_v39 = vmax.f32 %v813_v38, 0.0  ;;  %v815_v40 = vadd.f32 %v814_v8, %v732_v36 }
 0x268   : > { %823 = vst [vmem:[%s1076_s16 + $0x30] sm:$0xff] %v819_v39  ;;  %v820_v42 = vmax.f32 %v815_v40, 0.0 }
 0x26a   : > { %824 = vst [vmem:[%s1076_s16 + $0x38] sm:$0xff] %v820_v42 }
 0x26b   : > { %998 = dma.done.wait [#allocation2], 512 }
 0x26c   : > { %999 = vsyncadd [#allocation2], 4294966784 }
 0x26d PF: > { %s18_s27 = sadd.s32 1, %s1002_s27  }
 0x26e   : > { %p15_p4 = scmp.ge.s32.totalorder %s18_s27, 4  }
 0x270   :  { %17 = sbr.rel (!%p15_p4) target bundleno = 1 (0x1), region = 135 }
 0x275   :  { %851 = vsyncmov [#allocation2] }
 0x278   :  { %s852_s17 = vpop.sfrf %851 }
 0x279   :  { %p970_p5 = scmp.ne.s32.totalorder %s852_s17, 0 }
 0x27b   :  { %856 = shalt.err (%p970_p5)  }

</bundles_post_ra>
